<compile_context>
chip_gen: v7x
topology: tpu7x:2x2x1
jax: 0.10.0
libtpu: 0.0.40
codegen_flags: <defaults>
</compile_context>

<pallas_src>
import jax
import jax.numpy as jnp
from jax.experimental import pallas as pl
from jax.experimental.pallas import tpu as pltpu

HIDDEN = 256
LANE = 128


def _round_up(n, m):
    return ((n + m - 1) // m) * m


# ----------------------------------------------------------------------------
# Kernel
# ----------------------------------------------------------------------------
def actor_kernel(x_ref, w1_ref, b1_ref, w2_ref, b2_ref, w3_ref, b3_ref,
                 scale_ref, bias_ref, out_ref):
    # fc1 + relu  (bf16 operands on MXU, f32 accumulate, f32 elementwise)
    x = x_ref[...].astype(jnp.bfloat16)
    h1 = jnp.dot(x, w1_ref[...], preferred_element_type=jnp.float32)
    h1 = jnp.maximum(h1 + b1_ref[...], 0.0)
    # fc2 + relu
    h2 = jnp.dot(h1.astype(jnp.bfloat16), w2_ref[...],
                 preferred_element_type=jnp.float32)
    h2 = jnp.maximum(h2 + b2_ref[...], 0.0)
    # fc_mu + tanh
    mu = jnp.dot(h2.astype(jnp.bfloat16), w3_ref[...],
                 preferred_element_type=jnp.float32)
    mu = jnp.tanh(mu + b3_ref[...])
    # rescale to action range; padded output lanes compute 0*0+0 = 0 and are
    # sliced off in the wrapper -> full 128-lane unmasked store here.
    out_ref[...] = mu * scale_ref[...] + bias_ref[...]


# ----------------------------------------------------------------------------
# Wrapper
# ----------------------------------------------------------------------------
def actor_forward(x, kparams, act_dim):
    """x: [B, obs_dim] f32; kparams: padded/bf16 params from prepare_params."""
    (w1, b1, w2, b2, w3, b3, scale, bias) = kparams
    B, obs_dim = x.shape
    obs_pad, hidden = w1.shape
    act_pad = w3.shape[1]

    # Batch tiling: 128-row tiles for big batches, 8-row-aligned for tiny ones.
    tile_b = min(128, _round_up(B, 8))
    b_pad = _round_up(B, tile_b)

    # Pad batch rows and obs lanes with zeros (zeros * zero-padded w1 rows == 0).
    x_p = jnp.zeros((b_pad, obs_pad), jnp.float32).at[:B, :obs_dim].set(x)

    grid = (b_pad // tile_b,)
    const = lambda i: (0, 0)  # weights/biases resident across all grid steps

    flops = 2 * b_pad * (obs_pad * hidden + hidden * hidden + hidden * act_pad)
    bytes_accessed = (
        x_p.size * 4 + b_pad * act_pad * 4                       # x in, out
        + (w1.size + w2.size + w3.size) * 2                      # bf16 weights
        + (b1.size + b2.size + b3.size + scale.size + bias.size) * 4)

    out = pl.pallas_call(
        actor_kernel,
        out_shape=jax.ShapeDtypeStruct((b_pad, act_pad), jnp.float32),
        grid=grid,
        in_specs=[
            pl.BlockSpec((tile_b, obs_pad), lambda i: (i, 0)),   # x tile
            pl.BlockSpec((obs_pad, hidden), const),              # w1
            pl.BlockSpec((1, hidden), const),                    # b1
            pl.BlockSpec((hidden, hidden), const),               # w2
            pl.BlockSpec((1, hidden), const),                    # b2
            pl.BlockSpec((hidden, act_pad), const),              # w3
            pl.BlockSpec((1, act_pad), const),                   # b3
            pl.BlockSpec((1, act_pad), const),                   # action_scale
            pl.BlockSpec((1, act_pad), const),                   # action_bias
        ],
        out_specs=pl.BlockSpec((tile_b, act_pad), lambda i: (i, 0)),
        compiler_params=pltpu.CompilerParams(
            dimension_semantics=("parallel",)),
        cost_estimate=pl.CostEstimate(
            flops=flops,
            transcendentals=b_pad * act_pad,
            bytes_accessed=bytes_accessed),
    )(x_p, w1, b1, w2, b2, w3, b3, scale, bias)

    return out[:B, :act_dim]


# ----------------------------------------------------------------------------
# Parameters
# ----------------------------------------------------------------------------
def make_params(key, obs_dim, act_dim, hidden=HIDDEN):
    ks = jax.random.split(key, 3)

    def lin(k, fan_in, fan_out):
        bound = 1.0 / jnp.sqrt(fan_in)
        kw, kb = jax.random.split(k)
        w = jax.random.uniform(kw, (fan_in, fan_out), jnp.float32, -bound, bound)
        b = jax.random.uniform(kb, (1, fan_out), jnp.float32, -bound, bound)
        return w, b

    w1, b1 = lin(ks[0], obs_dim, hidden)
    w2, b2 = lin(ks[1], hidden, hidden)
    w3, b3 = lin(ks[2], hidden, act_dim)

    # synthetic action space: low = -2, high = 2  => scale = 2, bias = 0
    high = jnp.full((1, act_dim), 2.0, jnp.float32)
    low = jnp.full((1, act_dim), -2.0, jnp.float32)
    scale = (high - low) / 2.0
    bias = (high + low) / 2.0
    return (w1, b1, w2, b2, w3, b3, scale, bias)


def prepare_params(params):
    """Pad feature axes to 128 lanes and cast weights to bf16 (one-time setup)."""
    (w1, b1, w2, b2, w3, b3, scale, bias) = params
    obs_dim, hidden = w1.shape
    act_dim = w3.shape[1]
    obs_pad = _round_up(obs_dim, LANE)
    act_pad = _round_up(act_dim, LANE)

    def pad2(a, rows, cols):
        out = jnp.zeros((rows, cols), a.dtype)
        return out.at[:a.shape[0], :a.shape[1]].set(a)

    w1p = pad2(w1, obs_pad, hidden).astype(jnp.bfloat16)
    w2p = w2.astype(jnp.bfloat16)
    w3p = pad2(w3, hidden, act_pad).astype(jnp.bfloat16)
    b3p = pad2(b3, 1, act_pad)
    scalep = pad2(scale, 1, act_pad)
    biasp = pad2(bias, 1, act_pad)
    return (w1p, b1, w2p, b2, w3p, b3p, scalep, biasp)


# ----------------------------------------------------------------------------
# References
# ----------------------------------------------------------------------------
def reference_forward(x, params):
    (w1, b1, w2, b2, w3, b3, scale, bias) = params
    h1 = jnp.maximum(x @ w1 + b1, 0.0)
    h2 = jnp.maximum(h1 @ w2 + b2, 0.0)
    mu = jnp.tanh(h2 @ w3 + b3)
    return mu * scale + bias


def reference_forward_bf16(x, params):
    # Emulates kernel precision: bf16 matmul operands, f32 accumulate/elementwise.
    (w1, b1, w2, b2, w3, b3, scale, bias) = params
    bf = jnp.bfloat16

    def mm(a, w):
        return jax.lax.dot(a.astype(bf), w.astype(bf),
                           preferred_element_type=jnp.float32)

    h1 = jnp.maximum(mm(x, w1) + b1, 0.0)
    h2 = jnp.maximum(mm(h1, w2) + b2, 0.0)
    mu = jnp.tanh(mm(h2, w3) + b3)
    return mu * scale + bias


if __name__ == "__main__":
    key = jax.random.PRNGKey(0)
    k_x, k_p = jax.random.split(key)

    B, OBS, ACT = 8, 16, 4
    x = jax.random.normal(k_x, (B, OBS), jnp.float32)
    params = make_params(k_p, OBS, ACT)
    kparams = prepare_params(params)

    out = actor_forward(x, kparams, ACT)
    out = jax.block_until_ready(out)

    assert out.shape == (B, ACT)
    # Tight check vs. a reference that matches the kernel's bf16-operand precision.
    ref_bf16 = reference_forward_bf16(x, params)
    assert jnp.allclose(out, ref_bf16, atol=1e-3, rtol=1e-3)
    # Loose check vs. the full-f32 PyTorch-equivalent forward.
    ref_f32 = reference_forward(x, params)
    assert jnp.allclose(out, ref_f32, atol=5e-2, rtol=5e-2)

    print("KERNEL_OK")
</pallas_src>

<mosaic_0001>
module attributes {stable_mosaic.version = 11 : i64} {
  func.func @actor_kernel(%arg0: i32, %arg1: memref<8x128xf32, #tpu.memory_space<vmem>>, %arg2: memref<128x256xbf16, #tpu.memory_space<vmem>>, %arg3: memref<1x256xf32, #tpu.memory_space<vmem>>, %arg4: memref<256x256xbf16, #tpu.memory_space<vmem>>, %arg5: memref<1x256xf32, #tpu.memory_space<vmem>>, %arg6: memref<256x128xbf16, #tpu.memory_space<vmem>>, %arg7: memref<1x128xf32, #tpu.memory_space<vmem>>, %arg8: memref<1x128xf32, #tpu.memory_space<vmem>>, %arg9: memref<1x128xf32, #tpu.memory_space<vmem>>, %arg10: memref<8x128xf32, #tpu.memory_space<vmem>>) attributes {dimension_semantics = [#tpu.dimension_semantics<parallel>], iteration_bounds = array<i64: 1>, scalar_prefetch = 0 : i64, scratch_operands = 0 : i64, tpu.core_type = #tpu.core_type<tc>, window_params = [{transform_indices = @transform_0, window_bounds = array<i64: 8, 128>}, {pipeline_mode = #tpu.pipeline_mode<synchronous>, transform_indices = @transform_1, window_bounds = array<i64: 128, 256>}, {pipeline_mode = #tpu.pipeline_mode<synchronous>, transform_indices = @transform_2, window_bounds = array<i64: 1, 256>}, {pipeline_mode = #tpu.pipeline_mode<synchronous>, transform_indices = @transform_3, window_bounds = array<i64: 256, 256>}, {pipeline_mode = #tpu.pipeline_mode<synchronous>, transform_indices = @transform_4, window_bounds = array<i64: 1, 256>}, {pipeline_mode = #tpu.pipeline_mode<synchronous>, transform_indices = @transform_5, window_bounds = array<i64: 256, 128>}, {pipeline_mode = #tpu.pipeline_mode<synchronous>, transform_indices = @transform_6, window_bounds = array<i64: 1, 128>}, {pipeline_mode = #tpu.pipeline_mode<synchronous>, transform_indices = @transform_7, window_bounds = array<i64: 1, 128>}, {pipeline_mode = #tpu.pipeline_mode<synchronous>, transform_indices = @transform_8, window_bounds = array<i64: 1, 128>}, {transform_indices = @transform_9, window_bounds = array<i64: 8, 128>}]} {
    %c0 = arith.constant 0 : index
    %c0_0 = arith.constant 0 : index
    %0 = vector.load %arg1[%c0, %c0_0] : memref<8x128xf32, #tpu.memory_space<vmem>>, vector<8x128xf32>
    %1 = arith.truncf %0 : vector<8x128xf32> to vector<8x128xbf16>
    %c0_1 = arith.constant 0 : index
    %c0_2 = arith.constant 0 : index
    %2 = vector.load %arg2[%c0_1, %c0_2] : memref<128x256xbf16, #tpu.memory_space<vmem>>, vector<128x256xbf16>
    %cst = arith.constant dense<0.000000e+00> : vector<8x256xf32>
    %3 = tpu.matmul %1, %2, %cst {dimension_numbers = #tpu.dot_dimension_numbers<[1], [0], [0], [1], [0, 0, 1, 1], [], []>} : vector<8x128xbf16>, vector<128x256xbf16>, vector<8x256xf32> -> vector<8x256xf32>
    %c0_3 = arith.constant 0 : index
    %c0_4 = arith.constant 0 : index
    %4 = vector.load %arg3[%c0_3, %c0_4] : memref<1x256xf32, #tpu.memory_space<vmem>>, vector<1x256xf32>
    %5 = vector.broadcast %4 : vector<1x256xf32> to vector<8x256xf32>
    %6 = arith.addf %3, %5 : vector<8x256xf32>
    %cst_5 = arith.constant 0.000000e+00 : f32
    %7 = vector.broadcast %cst_5 : f32 to vector<8x256xf32>
    %8 = arith.maximumf %6, %7 : vector<8x256xf32>
    %9 = arith.truncf %8 : vector<8x256xf32> to vector<8x256xbf16>
    %c0_6 = arith.constant 0 : index
    %c0_7 = arith.constant 0 : index
    %10 = vector.load %arg4[%c0_6, %c0_7] : memref<256x256xbf16, #tpu.memory_space<vmem>>, vector<256x256xbf16>
    %cst_8 = arith.constant dense<0.000000e+00> : vector<8x256xf32>
    %11 = tpu.matmul %9, %10, %cst_8 {dimension_numbers = #tpu.dot_dimension_numbers<[1], [0], [0], [1], [0, 0, 1, 1], [], []>} : vector<8x256xbf16>, vector<256x256xbf16>, vector<8x256xf32> -> vector<8x256xf32>
    %c0_9 = arith.constant 0 : index
    %c0_10 = arith.constant 0 : index
    %12 = vector.load %arg5[%c0_9, %c0_10] : memref<1x256xf32, #tpu.memory_space<vmem>>, vector<1x256xf32>
    %13 = vector.broadcast %12 : vector<1x256xf32> to vector<8x256xf32>
    %14 = arith.addf %11, %13 : vector<8x256xf32>
    %cst_11 = arith.constant 0.000000e+00 : f32
    %15 = vector.broadcast %cst_11 : f32 to vector<8x256xf32>
    %16 = arith.maximumf %14, %15 : vector<8x256xf32>
    %17 = arith.truncf %16 : vector<8x256xf32> to vector<8x256xbf16>
    %c0_12 = arith.constant 0 : index
    %c0_13 = arith.constant 0 : index
    %18 = vector.load %arg6[%c0_12, %c0_13] : memref<256x128xbf16, #tpu.memory_space<vmem>>, vector<256x128xbf16>
    %cst_14 = arith.constant dense<0.000000e+00> : vector<8x128xf32>
    %19 = tpu.matmul %17, %18, %cst_14 {dimension_numbers = #tpu.dot_dimension_numbers<[1], [0], [0], [1], [0, 0, 1, 1], [], []>} : vector<8x256xbf16>, vector<256x128xbf16>, vector<8x128xf32> -> vector<8x128xf32>
    %c0_15 = arith.constant 0 : index
    %c0_16 = arith.constant 0 : index
    %20 = vector.load %arg7[%c0_15, %c0_16] : memref<1x128xf32, #tpu.memory_space<vmem>>, vector<1x128xf32>
    %21 = vector.broadcast %20 : vector<1x128xf32> to vector<8x128xf32>
    %22 = arith.addf %19, %21 : vector<8x128xf32>
    %23 = math.tanh %22 : vector<8x128xf32>
    %c0_17 = arith.constant 0 : index
    %c0_18 = arith.constant 0 : index
    %24 = vector.load %arg8[%c0_17, %c0_18] : memref<1x128xf32, #tpu.memory_space<vmem>>, vector<1x128xf32>
    %25 = vector.broadcast %24 : vector<1x128xf32> to vector<8x128xf32>
    %26 = arith.mulf %23, %25 : vector<8x128xf32>
    %c0_19 = arith.constant 0 : index
    %c0_20 = arith.constant 0 : index
    %27 = vector.load %arg9[%c0_19, %c0_20] : memref<1x128xf32, #tpu.memory_space<vmem>>, vector<1x128xf32>
    %28 = vector.broadcast %27 : vector<1x128xf32> to vector<8x128xf32>
    %29 = arith.addf %26, %28 : vector<8x128xf32>
    %c0_21 = arith.constant 0 : index
    %c0_22 = arith.constant 0 : index
    %30 = vector.load %arg10[%c0_21, %c0_22] : memref<8x128xf32, #tpu.memory_space<vmem>>, vector<8x128xf32>
    tpu.vector_store %arg10[%c0_21, %c0_22], %29 {strides = array<i32>} : memref<8x128xf32, #tpu.memory_space<vmem>>, vector<8x128xf32>,
    return
  }
  func.func @transform_0(%arg0: i32) -> (i32, i32) {
    %c0_i32 = arith.constant 0 : i32
    %c0_i32_0 = arith.constant 0 : i32
    return %arg0, %c0_i32 : i32, i32
  }
  func.func @transform_1(%arg0: i32) -> (i32, i32) {
    %c0_i32 = arith.constant 0 : i32
    %c0_i32_0 = arith.constant 0 : i32
    %c0_i32_1 = arith.constant 0 : i32
    return %c0_i32, %c0_i32_0 : i32, i32
  }
  func.func @transform_2(%arg0: i32) -> (i32, i32) {
    %c0_i32 = arith.constant 0 : i32
    %c0_i32_0 = arith.constant 0 : i32
    %c0_i32_1 = arith.constant 0 : i32
    return %c0_i32, %c0_i32_0 : i32, i32
  }
  func.func @transform_3(%arg0: i32) -> (i32, i32) {
    %c0_i32 = arith.constant 0 : i32
    %c0_i32_0 = arith.constant 0 : i32
    %c0_i32_1 = arith.constant 0 : i32
    return %c0_i32, %c0_i32_0 : i32, i32
  }
  func.func @transform_4(%arg0: i32) -> (i32, i32) {
    %c0_i32 = arith.constant 0 : i32
    %c0_i32_0 = arith.constant 0 : i32
    %c0_i32_1 = arith.constant 0 : i32
    return %c0_i32, %c0_i32_0 : i32, i32
  }
  func.func @transform_5(%arg0: i32) -> (i32, i32) {
    %c0_i32 = arith.constant 0 : i32
    %c0_i32_0 = arith.constant 0 : i32
    %c0_i32_1 = arith.constant 0 : i32
    return %c0_i32, %c0_i32_0 : i32, i32
  }
  func.func @transform_6(%arg0: i32) -> (i32, i32) {
    %c0_i32 = arith.constant 0 : i32
    %c0_i32_0 = arith.constant 0 : i32
    %c0_i32_1 = arith.constant 0 : i32
    return %c0_i32, %c0_i32_0 : i32, i32
  }
  func.func @transform_7(%arg0: i32) -> (i32, i32) {
    %c0_i32 = arith.constant 0 : i32
    %c0_i32_0 = arith.constant 0 : i32
    %c0_i32_1 = arith.constant 0 : i32
    return %c0_i32, %c0_i32_0 : i32, i32
  }
  func.func @transform_8(%arg0: i32) -> (i32, i32) {
    %c0_i32 = arith.constant 0 : i32
    %c0_i32_0 = arith.constant 0 : i32
    %c0_i32_1 = arith.constant 0 : i32
    return %c0_i32, %c0_i32_0 : i32, i32
  }
  func.func @transform_9(%arg0: i32) -> (i32, i32) {
    %c0_i32 = arith.constant 0 : i32
    %c0_i32_0 = arith.constant 0 : i32
    return %arg0, %c0_i32 : i32, i32
  }
}

</mosaic_0001>

<bundles_post_ra>
// kernel: tpu_custom_call.1
= control target key start
LH: loop header
LB: loop body
LE: loop exit
PB: predicated region body
PF: predicated region fallthrough
CT: control target
= control target key end

     0   :  { %14 = vsyncpa [#allocation3], 0  ;;  %s1149_s0 = inlined_call_operand.hbm [shape: f32[8,128], index: 0, kind: input, shape index: {}]   ;;  %s1150_s1 = inlined_call_operand.hbm [shape: bf16[128,256], index: 1, kind: input, shape index: {}]   ;;  %s1151_s2 = inlined_call_operand.vmem [shape: f32[1,256], index: 2, kind: input, shape index: {}]   ;;  %s1152_s3 = inlined_call_operand.hbm [shape: bf16[256,256], index: 3, kind: input, shape index: {}]   ;;  %s1153_s4 = inlined_call_operand.vmem [shape: f32[1,256], index: 4, kind: input, shape index: {}]   ;;  %s1154_s5 = inlined_call_operand.hbm [shape: bf16[256,128], index: 5, kind: input, shape index: {}]   ;;  %s1155_s6 = inlined_call_operand.vmem [shape: f32[1,128], index: 6, kind: input, shape index: {}]   ;;  %s1156_s7 = inlined_call_operand.vmem [shape: f32[1,128], index: 7, kind: input, shape index: {}]   ;;  %s1157_s8 = inlined_call_operand.vmem [shape: f32[1,128], index: 8, kind: input, shape index: {}]   ;;  %s1158_s9 = inlined_call_operand.hbm [shape: f32[8,128], index: 9, kind: output, shape index: {}]  }
   0x1   :  { %15 = vsyncpa [#allocation6], 0 }
   0x2   :  { %16 = vsyncpa [#allocation9], 0 }
   0x3   :  { %17 = vsyncpa [#allocation4], 0  ;;  %s1008_s30 = smov [#allocation5]   ;;  %s890_s13 = scalar_lea.hbm %s1150_s1, 2048 }
   0x4   :  { %s33_s10 = sshll.u32 %s1008_s30, 4  ;;  %p891_p0 = scmp.ne.s32.totalorder %s1150_s1, %s890_s13  ;;  %s34_s10 = int_to_ptr.vmem [resolvable:$true] %s33_s10 }
   0x5   :  { %p894_p1 = scmp.lt.u32.totalorder %s890_s13, %s1150_s1 }
   0x7   :  { %p896_p2 = pnand %p894_p1, %p891_p0 }
   0x9   :  { %899 = shalt.err (!%p896_p2)
}
   0xa   :  { %s900_s18 = scalar_lea.vmem %s34_s10, 2048  ;;  %p905_p4 = scmp.lt.s32.totalorder %s34_s10, %s34_s10 }
   0xb   :  { %p901_p3 = scmp.ne.s32.totalorder %s34_s10, %s900_s18  ;;  %p906_p5 = scmp.lt.s32.totalorder %s900_s18, %s900_s18 }
   0xd   :  { %p907_p6 = por %p906_p5, %p905_p4 }
   0xf   :  { %p908_p7 = pnand %p907_p6, %p901_p3 }
  0x11   :  { %911 = shalt.err (!%p908_p7)
}
  0x12   :  { %s1009_s19 = smov 128   ;;  %s1010_s20 = smov 8  }
  0x13   :  { %39 = dma.hbm_to_vmem [thread:$0]  %s1150_s1, 2048, %s34_s10, [#allocation6], %s1009_s19, %s1009_s19, %s1010_s20  }
  0x14   :  { %s1011_s23 = smov [#allocation2]   ;;  %s1012_s25 = smov [#allocation7]  }
  0x15   :  { %s24_s24 = sshll.u32 %s1011_s23, 4  ;;  %s47_s26 = sshll.u32 %s1012_s25, 4  ;;  %s25_s24 = int_to_ptr.vmem [resolvable:$true] %s24_s24  ;;  %s48_s26 = int_to_ptr.vmem [resolvable:$true] %s47_s26 }
  0x16   :  { %s912_s29 = scalar_lea.hbm %s1149_s0, 128 }
  0x17   :  { %p913_p8 = scmp.ne.s32.totalorder %s1149_s0, %s912_s29  ;;  %p916_p9 = scmp.lt.u32.totalorder %s912_s29, %s1149_s0 }
  0x19   :  { %p918_p10 = pnand %p916_p9, %p913_p8 }
  0x1b   :  { %921 = shalt.err (!%p918_p10)
}
  0x1c   :  { %s922_s1 = scalar_lea.vmem %s25_s24, 128  ;;  %p927_p12 = scmp.lt.s32.totalorder %s25_s24, %s25_s24 }
  0x1d   :  { %p923_p11 = scmp.ne.s32.totalorder %s25_s24, %s922_s1  ;;  %p928_p13 = scmp.lt.s32.totalorder %s922_s1, %s922_s1 }
  0x1f   :  { %p929_p0 = por %p928_p13, %p927_p12 }
  0x21   :  { %p930_p1 = pnand %p929_p0, %p923_p11 }
  0x23   :  { %933 = shalt.err (!%p930_p1)
}
  0x24   :  { %27 = dma.hbm_to_vmem [thread:$0]  %s1149_s0, 128, %s25_s24, [#allocation3]  }
  0x25   :  { %s934_s17 = scalar_lea.hbm %s1152_s3, 4096 }
  0x26   :  { %p935_p2 = scmp.ne.s32.totalorder %s1152_s3, %s934_s17  ;;  %p938_p3 = scmp.lt.u32.totalorder %s934_s17, %s1152_s3 }
  0x28   :  { %p940_p4 = pnand %p938_p3, %p935_p2 }
  0x2a   :  { %943 = shalt.err (!%p940_p4)
}
  0x2b   :  { %s944_s25 = scalar_lea.vmem %s48_s26, 4096  ;;  %p949_p6 = scmp.lt.s32.totalorder %s48_s26, %s48_s26 }
  0x2c   :  { %p945_p5 = scmp.ne.s32.totalorder %s48_s26, %s944_s25  ;;  %p950_p7 = scmp.lt.s32.totalorder %s944_s25, %s944_s25 }
  0x2e   :  { %p951_p8 = por %p950_p7, %p949_p6 }
  0x30   :  { %p952_p9 = pnand %p951_p8, %p945_p5 }
  0x32   :  { %955 = shalt.err (!%p952_p9)
}
  0x33   :  { %53 = dma.hbm_to_vmem [thread:$0]  %s1152_s3, 4096, %s48_s26, [#allocation6], %s1009_s19, %s1009_s19, %s1010_s20  }
  0x34   :  { %s1013_s27 = smov [#allocation8]   ;;  %s956_s11 = scalar_lea.hbm %s1154_s5, 2048 }
  0x35   :  { %s61_s28 = sshll.u32 %s1013_s27, 4  ;;  %p957_p10 = scmp.ne.s32.totalorder %s1154_s5, %s956_s11  ;;  %s62_s28 = int_to_ptr.vmem [resolvable:$true] %s61_s28 }
  0x36   :  { %p960_p11 = scmp.lt.u32.totalorder %s956_s11, %s1154_s5 }
  0x38   :  { %p962_p12 = pnand %p960_p11, %p957_p10 }
  0x3a   :  { %965 = shalt.err (!%p962_p12)
}
  0x3b   :  { %s966_s14 = scalar_lea.vmem %s62_s28, 2048  ;;  %p971_p0 = scmp.lt.s32.totalorder %s62_s28, %s62_s28 }
  0x3c   :  { %p967_p13 = scmp.ne.s32.totalorder %s62_s28, %s966_s14  ;;  %p972_p1 = scmp.lt.s32.totalorder %s966_s14, %s966_s14 }
  0x3e   :  { %p973_p2 = por %p972_p1, %p971_p0 }
  0x40   :  { %p974_p3 = pnand %p973_p2, %p967_p13 }
  0x42   :  { %977 = shalt.err (!%p974_p3)
}
  0x43   :  { %s1014_s3 = smov 64   ;;  %s1015_s19 = smov 4  }
  0x44   :  { %67 = dma.hbm_to_vmem [thread:$0]  %s1154_s5, 2048, %s62_s28, [#allocation9], %s1014_s3, %s1014_s3, %s1015_s19  }
  0x45   :  { %1000 = dma.done.wait [#allocation3], 128  }
  0x46   :  { %1001 = vsyncadd [#allocation3], 4294967168 }
  0x47   :  { %1002 = dma.done.wait [#allocation6], 6144  }
  0x48   :  { %1003 = vsyncadd [#allocation6], 4294961152 }
  0x49   :  { %1004 = dma.done.wait [#allocation9], 2048  }
  0x4a   :  { %1005 = vsyncadd [#allocation9], 4294965248  ;;  %v1016_v0 = vmov 0   ;;  %v800_v1 = vld [vmem:[#allocation5 + $0x4] ss:$8 sps:$4 sm:$0xff]   ;;  %v87_v26 = vld [vmem:[#allocation2] sm:$0xff]  ;;  %v107_v63 = vlaneseq }
  0x4b   :  { %229 = vmatprep.mubr.bf16.mxu0 %v1016_v0  ;;  %v802_v2 = vld [vmem:[#allocation5] ss:$8 sps:$4 sm:$0xff]   ;;  %197 = vmatprep.subr.bf16.mxu0 %v800_v1  ;;  %v803_v3 = vld [vmem:[#allocation5 + $0x14] ss:$8 sps:$4 sm:$0xff]   ;;  %v805_v4 = vld [vmem:[#allocation5 + $0x10] ss:$8 sps:$4 sm:$0xff]   ;;  %v88_v31 = vpack.c.bf16 %v87_v26, %v87_v26 }
  0x4c   :  { %198 = vmatpush1.bf16.msra.mxu0 %v802_v2  ;;  %v806_v5 = vld [vmem:[#allocation5 + $0x24] ss:$8 sps:$4 sm:$0xff]   ;;  %v808_v6 = vld [vmem:[#allocation5 + $0x20] ss:$8 sps:$4 sm:$0xff]   ;;  %v809_v7 = vld [vmem:[#allocation5 + $0x34] ss:$8 sps:$4 sm:$0xff]  }
  0x4d   :  { %199 = vmatprep.subr.bf16.mxu0 %v803_v3  ;;  %v811_v8 = vld [vmem:[#allocation5 + $0x30] ss:$8 sps:$4 sm:$0xff]   ;;  %v812_v9 = vld [vmem:[#allocation5 + $0x44] ss:$8 sps:$4 sm:$0xff]   ;;  %v826_v11 = vld [vmem:[#allocation7] ss:$8 sps:$4 sm:$0xff]  }
  0x4e   :  { %v824_v10 = vld [vmem:[#allocation7 + $0x4] ss:$8 sps:$4 sm:$0xff]   ;;  %v827_v12 = vld [vmem:[#allocation7 + $0x14] ss:$8 sps:$4 sm:$0xff]   ;;  %v814_v13 = vld [vmem:[#allocation5 + $0x40] ss:$8 sps:$4 sm:$0xff]  }
  0x4f   :  { %446 = vmatprep.subr.bf16.mxu1 %v824_v10  ;;  %v829_v14 = vld [vmem:[#allocation7 + $0x10] ss:$8 sps:$4 sm:$0xff]   ;;  %v830_v15 = vld [vmem:[#allocation7 + $0x24] ss:$8 sps:$4 sm:$0xff]   ;;  %v815_v16 = vld [vmem:[#allocation5 + $0x54] ss:$8 sps:$4 sm:$0xff]  }
  0x50   :  { %200 = vmatpush1.bf16.msra.mxu0 %v805_v4  ;;  %447 = vmatpush1.bf16.msra.mxu1 %v826_v11  ;;  %v817_v17 = vld [vmem:[#allocation5 + $0x50] ss:$8 sps:$4 sm:$0xff]   ;;  %v832_v18 = vld [vmem:[#allocation7 + $0x20] ss:$8 sps:$4 sm:$0xff]   ;;  %v833_v19 = vld [vmem:[#allocation7 + $0x34] ss:$8 sps:$4 sm:$0xff]  }
  0x51   :  { %201 = vmatprep.subr.bf16.mxu0 %v806_v5  ;;  %448 = vmatprep.subr.bf16.mxu1 %v827_v12  ;;  %v818_v20 = vld [vmem:[#allocation5 + $0x64] ss:$8 sps:$4 sm:$0xff]   ;;  %v820_v21 = vld [vmem:[#allocation5 + $0x60] ss:$8 sps:$4 sm:$0xff]   ;;  %v835_v22 = vld [vmem:[#allocation7 + $0x30] ss:$8 sps:$4 sm:$0xff]  }
  0x52   :  { %v836_v23 = vld [vmem:[#allocation7 + $0x44] ss:$8 sps:$4 sm:$0xff]   ;;  %v821_v24 = vld [vmem:[#allocation5 + $0x74] ss:$8 sps:$4 sm:$0xff]   ;;  %v823_v25 = vld [vmem:[#allocation5 + $0x70] ss:$8 sps:$4 sm:$0xff]  }
  0x53   :  { %v838_v27 = vld [vmem:[#allocation7 + $0x40] ss:$8 sps:$4 sm:$0xff]   ;;  %v839_v28 = vld [vmem:[#allocation7 + $0x54] ss:$8 sps:$4 sm:$0xff]   ;;  %v841_v29 = vld [vmem:[#allocation7 + $0x50] ss:$8 sps:$4 sm:$0xff]  }
  0x54   :  { %202 = vmatpush1.bf16.msra.mxu0 %v808_v6  ;;  %449 = vmatpush1.bf16.msra.mxu1 %v829_v14  ;;  %v842_v30 = vld [vmem:[#allocation7 + $0x64] ss:$8 sps:$4 sm:$0xff]   ;;  %v844_v32 = vld [vmem:[#allocation7 + $0x60] ss:$8 sps:$4 sm:$0xff]   ;;  %v845_v33 = vld [vmem:[#allocation7 + $0x74] ss:$8 sps:$4 sm:$0xff]  }
  0x55   :  { %203 = vmatprep.subr.bf16.mxu0 %v809_v7  ;;  %450 = vmatprep.subr.bf16.mxu1 %v830_v15  ;;  %v847_v34 = vld [vmem:[#allocation7 + $0x70] ss:$8 sps:$4 sm:$0xff]   ;;  %v848_v35 = vld [vmem:[#allocation7 + $0x84] ss:$8 sps:$4 sm:$0xff]   ;;  %v850_v36 = vld [vmem:[#allocation7 + $0x80] ss:$8 sps:$4 sm:$0xff]  }
  0x56   :  { %v851_v37 = vld [vmem:[#allocation7 + $0x94] ss:$8 sps:$4 sm:$0xff]   ;;  %v853_v38 = vld [vmem:[#allocation7 + $0x90] ss:$8 sps:$4 sm:$0xff]   ;;  %v854_v39 = vld [vmem:[#allocation7 + $0xa4] ss:$8 sps:$4 sm:$0xff]  }
  0x57   :  { %v856_v40 = vld [vmem:[#allocation7 + $0xa0] ss:$8 sps:$4 sm:$0xff]   ;;  %v857_v41 = vld [vmem:[#allocation7 + $0xb4] ss:$8 sps:$4 sm:$0xff]   ;;  %v859_v42 = vld [vmem:[#allocation7 + $0xb0] ss:$8 sps:$4 sm:$0xff]  }
  0x58   :  { %204 = vmatpush1.bf16.msra.mxu0 %v811_v8  ;;  %451 = vmatpush1.bf16.msra.mxu1 %v832_v18  ;;  %v860_v43 = vld [vmem:[#allocation7 + $0xc4] ss:$8 sps:$4 sm:$0xff]   ;;  %v862_v44 = vld [vmem:[#allocation7 + $0xc0] ss:$8 sps:$4 sm:$0xff]   ;;  %v863_v45 = vld [vmem:[#allocation7 + $0xd4] ss:$8 sps:$4 sm:$0xff]  }
  0x59   :  { %205 = vmatprep.subr.bf16.mxu0 %v812_v9  ;;  %452 = vmatprep.subr.bf16.mxu1 %v833_v19  ;;  %v865_v46 = vld [vmem:[#allocation7 + $0xd0] ss:$8 sps:$4 sm:$0xff]   ;;  %v866_v47 = vld [vmem:[#allocation7 + $0xe4] ss:$8 sps:$4 sm:$0xff]   ;;  %v868_v48 = vld [vmem:[#allocation7 + $0xe0] ss:$8 sps:$4 sm:$0xff]  }
  0x5a   :  { %v869_v49 = vld [vmem:[#allocation7 + $0xf4] ss:$8 sps:$4 sm:$0xff]   ;;  %v871_v50 = vld [vmem:[#allocation7 + $0xf0] ss:$8 sps:$4 sm:$0xff]   ;;  %v872_v51 = vld [vmem:[#allocation8 + $0x40] sm:$0xff]   ;;  %v108_v0 = vshrl.u32 %v107_v63, 7 }
  0x5b   :  { %v873_v52 = vld [vmem:[#allocation8] sm:$0xff]   ;;  %v874_v53 = vld [vmem:[#allocation8 + $0x48] sm:$0xff]   ;;  %v876_v55 = vld [vmem:[#allocation8 + $0x50] sm:$0xff]   ;;  %s1017_s25 = smov [#allocation10]  }
  0x5c   :  { %206 = vmatpush1.bf16.msra.mxu0 %v814_v13  ;;  %453 = vmatpush1.bf16.msra.mxu1 %v835_v22  ;;  %v875_v54 = vld [vmem:[#allocation8 + $0x8] sm:$0xff]   ;;  %v877_v56 = vld [vmem:[#allocation8 + $0x10] sm:$0xff]   ;;  %v878_v57 = vld [vmem:[#allocation8 + $0x58] sm:$0xff]   ;;  %v109_v1 = vsub.s32 0, %v108_v0  ;;  %v113_v3 = vsub.s32 1, %v108_v0  ;;  %s690_s0 = sshll.u32 %s1017_s25, 4  ;;  %s691_s0 = int_to_ptr.vmem [resolvable:$true] %s690_s0 }
  0x5d   :  { %207 = vmatprep.subr.bf16.mxu0 %v815_v16  ;;  %454 = vmatprep.subr.bf16.mxu1 %v836_v23  ;;  %v879_v58 = vld [vmem:[#allocation8 + $0x18] sm:$0xff]   ;;  %v880_v59 = vld [vmem:[#allocation8 + $0x60] sm:$0xff]   ;;  %v882_v61 = vld [vmem:[#allocation8 + $0x68] sm:$0xff]   ;;  %p983_p5 = scmp.lt.s32.totalorder %s691_s0, %s691_s0 }
  0x5e   :  { %v881_v60 = vld [vmem:[#allocation8 + $0x20] sm:$0xff]   ;;  %v883_v62 = vld [vmem:[#allocation8 + $0x28] sm:$0xff]   ;;  %v105_v2 = vld [vmem:[%s1151_s2] sm:$0x3] }
  0x5f   :  { %v110_v4 = vrot.slane %v105_v2, %v109_v1  ;;  %v114_v5 = vrot.slane %v105_v2, %v113_v3  ;;  %v884_v16 = vld [vmem:[#allocation8 + $0x70] sm:$0xff]   ;;  %v886_v18 = vld [vmem:[#allocation8 + $0x78] sm:$0xff]  }
  0x60   :  { %208 = vmatpush1.bf16.msra.mxu0 %v817_v17  ;;  %455 = vmatpush1.bf16.msra.mxu1 %v838_v27  ;;  %v885_v17 = vld [vmem:[#allocation8 + $0x30] sm:$0xff]   ;;  %v887_v19 = vld [vmem:[#allocation8 + $0x38] sm:$0xff]  }
  0x61   :  { %209 = vmatprep.subr.bf16.mxu0 %v818_v20  ;;  %456 = vmatprep.subr.bf16.mxu1 %v839_v28  ;;  %v274_v20 = vld [vmem:[%s1153_s4] sm:$0x3] }
  0x62   :  { %v283_v22 = vrot.slane %v274_v20, %v113_v3 }
  0x64   :  { %210 = vmatpush1.bf16.msra.mxu0 %v820_v21  ;;  %457 = vmatpush1.bf16.msra.mxu1 %v841_v29  ;;  %v279_v21 = vrot.slane %v274_v20, %v109_v1 }
  0x65   :  { %211 = vmatprep.subr.bf16.mxu0 %v821_v24  ;;  %458 = vmatprep.subr.bf16.mxu1 %v842_v30 }
  0x68   :  { %212 = vmatpush1.bf16.msra.mxu0 %v823_v25  ;;  %459 = vmatpush1.bf16.msra.mxu1 %v844_v32 }
  0x69   :  { %460 = vmatprep.subr.bf16.mxu1 %v845_v33  ;;  %768 = vmatprep.subr.bf16.mxu0 %v872_v51 }
  0x6b   :  { %230 = vmatmul.mubr.bf16.vlgmr.msra.gmra.mrb[0].mxu0 %v88_v31 }
  0x6c   :  { %461 = vmatpush1.bf16.msra.mxu1 %v847_v34  ;;  %769 = vmatpush3.bf16.msra.mxu0 %v873_v52  ;;  %v749_v34 = vld [vmem:[%s1155_s6] ss:$0 sm:$0xff]  ;;  %s978_s6 = scalar_lea.vmem %s691_s0, 128 }
  0x6d   :  { %462 = vmatprep.subr.bf16.mxu1 %v848_v35  ;;  %770 = vmatprep.subr.bf16.mxu0 %v874_v53  ;;  %p979_p4 = scmp.ne.s32.totalorder %s691_s0, %s978_s6  ;;  %p984_p6 = scmp.lt.s32.totalorder %s978_s6, %s978_s6 }
  0x6f   :  { %p985_p7 = por %p984_p6, %p983_p5 }
  0x70   :  { %463 = vmatpush1.bf16.msra.mxu1 %v850_v36  ;;  %771 = vmatpush3.bf16.msra.mxu0 %v875_v54 }
  0x71   :  { %464 = vmatprep.subr.bf16.mxu1 %v851_v37  ;;  %772 = vmatprep.subr.bf16.mxu0 %v876_v55  ;;  %p986_p8 = pnand %p985_p7, %p979_p4 }
  0x74   :  { %465 = vmatpush1.bf16.msra.mxu1 %v853_v38  ;;  %773 = vmatpush3.bf16.msra.mxu0 %v877_v56 }
  0x75   :  { %466 = vmatprep.subr.bf16.mxu1 %v854_v39  ;;  %774 = vmatprep.subr.bf16.mxu0 %v878_v57 }
  0x78   :  { %467 = vmatpush1.bf16.msra.mxu1 %v856_v40  ;;  %775 = vmatpush3.bf16.msra.mxu0 %v879_v58  ;;  %v766_v40 = vld [vmem:[%s1156_s7] ss:$0 sm:$0xff] }
  0x79   :  { %468 = vmatprep.subr.bf16.mxu1 %v857_v41  ;;  %776 = vmatprep.subr.bf16.mxu0 %v880_v59 }
  0x7c   :  { %469 = vmatpush1.bf16.msra.mxu1 %v859_v42  ;;  %777 = vmatpush3.bf16.msra.mxu0 %v881_v60  ;;  %v767_v42 = vld [vmem:[%s1157_s8] ss:$0 sm:$0xff] }
  0x7d   :  { %470 = vmatprep.subr.bf16.mxu1 %v860_v43  ;;  %778 = vmatprep.subr.bf16.mxu0 %v882_v61 }
  0x80   :  { %471 = vmatpush1.bf16.msra.mxu1 %v862_v44  ;;  %779 = vmatpush3.bf16.msra.mxu0 %v883_v62 }
  0x81   :  { %472 = vmatprep.subr.bf16.mxu1 %v863_v45  ;;  %780 = vmatprep.subr.bf16.mxu0 %v884_v16 }
  0x84   :  { %473 = vmatpush1.bf16.msra.mxu1 %v865_v46  ;;  %781 = vmatpush3.bf16.msra.mxu0 %v885_v17 }
  0x85   :  { %474 = vmatprep.subr.bf16.mxu1 %v866_v47  ;;  %782 = vmatprep.subr.bf16.mxu0 %v886_v18 }
  0x88   :  { %475 = vmatpush1.bf16.msra.mxu1 %v868_v48  ;;  %783 = vmatpush3.bf16.msra.mxu0 %v887_v19 }
  0x89   :  { %476 = vmatprep.subr.bf16.mxu1 %v869_v49 }
  0x8c   :  { %477 = vmatpush1.bf16.msra.mxu1 %v871_v50 }
 0x13e   :  { %v231_v6 = vpop.f32.mrb[0].mxu0 }
 0x13f   :  { %v232_v7 = vadd.f32 %v231_v6, %v110_v4  ;;  %v233_v8 = vpop.f32.mrb[1].mxu0 }
 0x140   :  { %v234_v9 = vadd.f32 %v233_v8, %v114_v5  ;;  %v235_v10 = vpop.f32.mrb[2].mxu0 }
 0x141   :  { %v238_v11 = vmax.f32 %v232_v7, 0.0  ;;  %v236_v12 = vpop.f32.mrb[3].mxu0 }
 0x142   :  { %v239_v13 = vmax.f32 %v234_v9, 0.0 }
 0x143   :  { %v240_v15 = vpack.c.bf16 %v238_v11, %v238_v11 }
 0x144   :  { %v241_v14 = vpack.c.bf16 %v239_v13, %v239_v13 }
 0x146   :  { %478 = vmatprep.mubr.bf16.mxu1 %v241_v14 }
 0x147   :  { %479 = vmatmul.mubr.bf16.vlgmr.msra.gmra.mrb[0].mxu1 %v240_v15 }
 0x21a   :  { %v480_v23 = vpop.f32.mrb[0].mxu1 }
 0x21b   :  { %v481_v24 = vadd.f32 %v480_v23, %v279_v21  ;;  %v482_v25 = vpop.f32.mrb[1].mxu1 }
 0x21c   :  { %v483_v26 = vadd.f32 %v482_v25, %v283_v22  ;;  %v484_v27 = vpop.f32.mrb[2].mxu1 }
 0x21d   :  { %v487_v28 = vmax.f32 %v481_v24, 0.0  ;;  %v485_v29 = vpop.f32.mrb[3].mxu1 }
 0x21e   :  { %v488_v30 = vmax.f32 %v483_v26, 0.0 }
 0x21f   :  { %v489_v32 = vpack.c.bf16 %v487_v28, %v487_v28 }
 0x220   :  { %v490_v31 = vpack.c.bf16 %v488_v30, %v488_v30 }
 0x222   :  { %658 = vmatprep.mubr.bf16.mxu0 %v490_v31 }
 0x223   :  { %659 = vmatmul.mubr.bf16.vlgmr.msra.gmra.mrb[4].mxu0 %v489_v32 }
 0x2f6   :  { %v784_v33 = vpop.f32.mrb[4].mxu0 }
 0x2f7   :  { %v785_v35 = vpop.f32.mrb[5].mxu0 }
 0x2f8   :  { %v786_v36 = vadd.f32 %v785_v35, %v784_v33  ;;  %v787_v37 = vpop.f32.mrb[6].mxu0 }
 0x2f9   :  { %v788_v38 = vpop.f32.mrb[7].mxu0 }
 0x2fa   :  { %v661_v39 = vadd.f32 %v786_v36, %v749_v34 }
 0x2fc   :  { %888 = vtanh.f32 %v661_v39 }
 0x306   :  { %v889_v41 = vpop.eup %888 }
 0x307   :  { %v674_v43 = vmul.f32 %v889_v41, %v766_v40 }
 0x309   :  { %v682_v44 = vadd.f32 %v767_v42, %v674_v43 }
 0x30b   :  { %683 = vst [vmem:[#allocation10] sm:$0xff] %v682_v44 }
 0x30c   :  { %989 = shalt.err (!%p986_p8)
}
 0x30d   :  { %s990_s27 = scalar_lea.hbm %s1158_s9, 128 }
 0x30e   :  { %p991_p9 = scmp.ne.s32.totalorder %s1158_s9, %s990_s27  ;;  %p994_p10 = scmp.lt.u32.totalorder %s990_s27, %s1158_s9 }
 0x310   :  { %p996_p11 = pnand %p994_p10, %p991_p9 }
 0x312   :  { %999 = shalt.err (!%p996_p11)
}
 0x313   :  { %693 = dma.vmem_to_hbm [thread:$0]  %s691_s0, 128, %s1158_s9, [#allocation4]  }
 0x314   :  { %1006 = dma.done.wait [#allocation4], 128  }
 0x315   :  { %1007 = vsyncadd [#allocation4], 4294967168 }
 0x316   :  { %697 = vsyncpa [#allocation3], 1 }
 0x317   :  { %698 = vsyncpa [#allocation6], 1 }
 0x318   :  { %699 = vsyncpa [#allocation9], 1 }
 0x319   :  { %700 = vsyncpa [#allocation4], 1 }

</bundles_post_ra>
